<compile_context>
chip_gen: v6e
topology: v6e:2x2x1
jax: 0.10.0
libtpu: 0.0.40
codegen_flags: <defaults>
</compile_context>

<pallas_src>
import jax
import jax.numpy as jnp
from jax.experimental import pallas as pl
from jax.experimental.pallas import tpu as pltpu

EPS = 1e-8


# --------------------------------------------------------------------------
# Kernels
# --------------------------------------------------------------------------
def _adain_fused_kernel(x_ref, ss_ref, o_ref):
    """Single-pass AdaIN: per-channel mean + fused normalize / style-mod.

    x_ref : (1, TC, HW)  native dtype
    ss_ref: (1, TC, 2)   f32, [..., 0] = scale + 1, [..., 1] = shift
    o_ref : (1, TC, HW)
    """
    # f32-accumulated per-channel mean computed directly from the native-dtype
    # block: no full-block f32 copy held live across the output expression.
    m = jnp.mean(x_ref[...], axis=-1, keepdims=True, dtype=jnp.float32)  # (1, TC, 1)

    ss = ss_ref[...]                         # (1, TC, 2) f32 -- one tiny DMA/step
    a1 = ss[:, :, 0:1]                       # scale + 1
    shift = ss[:, :, 1:2]

    a = jax.lax.rsqrt(m + EPS) * a1          # rsqrt on the EUP slot
    b = shift - m * a

    # Cast a/b once per channel; elementwise math in the native dtype
    # (bf16 VPU on v6e/v7x; identity cast for f32): 2 VPU ops / element.
    dt = o_ref.dtype
    o_ref[...] = x_ref[...] * a.astype(dt) + b.astype(dt)


def _adain_modulate_kernel(x_ref, ab_ref, o_ref):
    """Elementwise modulate for the large-HW two-pass path (mean done in XLA).

    x_ref : (1, TC, THW)  native dtype
    ab_ref: (1, TC, 2)    f32, out = x * ab[...,0] + ab[...,1]
    o_ref : (1, TC, THW)
    """
    ab = ab_ref[...]
    dt = o_ref.dtype
    a = ab[:, :, 0:1].astype(dt)
    b = ab[:, :, 1:2].astype(dt)
    o_ref[...] = x_ref[...] * a + b


# --------------------------------------------------------------------------
# Tiling heuristics
# --------------------------------------------------------------------------
def _sublane_multiple(dtype):
    """Native packed sublane tile: 8 for f32, 16 for bf16, 32 for int8/fp8."""
    return max(8, 32 // jnp.dtype(dtype).itemsize)


def _target_block_bytes():
    """Per-generation x/out block byte target (amortize ~0.35us/step vs HBM BW)."""
    try:
        kind = jax.devices()[0].device_kind.lower()
    except Exception:
        kind = ""
    if "v7" in kind:
        return 8 * 1024 * 1024   # 3.2 TB/s HBM: bigger blocks cut per-step overhead
    if "v5" in kind:
        return 3 * 1024 * 1024   # 0.82 TB/s HBM: bigger blocks buy nothing
    return 4 * 1024 * 1024       # v6e default


def _vmem_limit_bytes(block_bytes):
    """Scoped-VMEM limit from the real footprint: double-buffered in + out
    x-blocks plus small per-channel temps; capped under v7x's 64 MiB physical."""
    need = 4 * block_bytes + (2 << 20)
    return int(min(56 * 1024 * 1024, max(16 * 1024 * 1024, need)))


def _legal_channel_tiles(C, sub):
    """Channel tiles that divide C and satisfy the sublane rule
    (tc % sub == 0, or tc == C which is always legal)."""
    tiles = [tc for tc in range(sub, C, sub) if C % tc == 0]
    tiles.append(C)
    return tiles


def _pick_hw_tile(HW, tc, itemsize, target_bytes):
    """Largest multiple-of-128 divisor of HW keeping a (tc, t_hw) block under
    the byte target (lane-dense, unmasked stores)."""
    divisors = [d for d in range(128, HW + 1, 128) if HW % d == 0]
    fitting = [d for d in divisors if tc * d * itemsize <= target_bytes]
    if fitting:
        return max(fitting)
    if divisors:
        return min(divisors)
    # TODO(synk): HW with no multiple-of-128 divisor AND too large for a single
    # block would need padded/Element tiling; fall back to the full extent.
    return HW


# --------------------------------------------------------------------------
# Wrapper
# --------------------------------------------------------------------------
def adain_forward(x, dlatent, weight, bias, *, channel_tile=None, target_bytes=None):
    """AdaIN forward.  x: (N, C, H, W); dlatent: (N, D); weight: (2C, D); bias: (2C,)."""
    N, C, H, W = x.shape
    HW = H * W
    itemsize = x.dtype.itemsize

    # Style linear hoisted out of the kernel (tiny GEMM; wasteful on MXU).
    style = (dlatent.astype(jnp.float32) @ weight.T.astype(jnp.float32)
             + bias.astype(jnp.float32))                  # (N, 2C) f32
    scale1 = style[:, :C] + 1.0                           # (N, C)  scale + 1
    shift = style[:, C:]                                  # (N, C)

    # Flatten spatial dims -> lane-dense last dim (row-major, free reshape).
    x3 = x.reshape(N, C, HW)

    if target_bytes is None:
        target_bytes = _target_block_bytes()

    sub = _sublane_multiple(x.dtype)
    tiles = _legal_channel_tiles(C, sub)

    if channel_tile is not None:
        assert C % channel_tile == 0, "channel_tile must divide C"
        tc = channel_tile
        use_fused = True
    else:
        fitting = [t for t in tiles if t * HW * itemsize <= target_bytes]
        if fitting:
            use_fused = True
            if N == 1:
                # Prefer >= 2 total grid steps so v7x megacore uses both TCs
                # (free on v5e/v6e which have a single TensorCore).
                multi = [t for t in fitting if C // t >= 2]
                tc = max(multi) if multi else max(fitting)
            else:
                tc = max(fitting)
        else:
            # Even the smallest legal channel tile blows the block budget
            # (large StyleGAN feature maps): two-pass path with HW tiling.
            use_fused = False
            tc = min(tiles)

    if use_fused:
        ss = jnp.stack([scale1, shift], axis=-1)          # (N, C, 2) f32
        block_bytes = tc * HW * itemsize
        out = pl.pallas_call(
            _adain_fused_kernel,
            out_shape=jax.ShapeDtypeStruct((N, C, HW), x.dtype),
            grid_spec=pltpu.PrefetchScalarGridSpec(
                num_scalar_prefetch=0,
                grid=(N, C // tc),
                in_specs=[
                    pl.BlockSpec((1, tc, HW), lambda n, c: (n, c, 0)),
                    pl.BlockSpec((1, tc, 2), lambda n, c: (n, c, 0)),
                ],
                out_specs=pl.BlockSpec((1, tc, HW), lambda n, c: (n, c, 0)),
            ),
            compiler_params=pltpu.CompilerParams(
                dimension_semantics=("parallel", "parallel"),
                vmem_limit_bytes=_vmem_limit_bytes(block_bytes),
            ),
        )(x3, ss)
    else:
        # Two-pass: per-channel mean as a fused XLA reduction (one HBM pass),
        # then a purely elementwise Pallas modulate tiled over (channel, HW).
        m = jnp.mean(x3, axis=-1, dtype=jnp.float32)      # (N, C) f32
        a = jax.lax.rsqrt(m + EPS) * scale1
        b = shift - m * a
        ab = jnp.stack([a, b], axis=-1)                   # (N, C, 2) f32

        t_hw = _pick_hw_tile(HW, tc, itemsize, target_bytes)
        block_bytes = tc * t_hw * itemsize
        out = pl.pallas_call(
            _adain_modulate_kernel,
            out_shape=jax.ShapeDtypeStruct((N, C, HW), x.dtype),
            grid_spec=pltpu.PrefetchScalarGridSpec(
                num_scalar_prefetch=0,
                grid=(N, C // tc, HW // t_hw),
                in_specs=[
                    pl.BlockSpec((1, tc, t_hw), lambda n, c, h: (n, c, h)),
                    pl.BlockSpec((1, tc, 2), lambda n, c, h: (n, c, 0)),
                ],
                out_specs=pl.BlockSpec((1, tc, t_hw), lambda n, c, h: (n, c, h)),
            ),
            compiler_params=pltpu.CompilerParams(
                dimension_semantics=("parallel", "parallel", "parallel"),
                vmem_limit_bytes=_vmem_limit_bytes(block_bytes),
            ),
        )(x3, ab)

    return out.reshape(N, C, H, W)


def reference_adain(x, dlatent, weight, bias):
    """Pure-JAX reference mirroring the PyTorch module."""
    N, C, H, W = x.shape
    style = dlatent @ weight.T + bias                     # (N, 2C)
    style = style.reshape(N, 2, C, 1, 1)
    m = jnp.mean(x, axis=(2, 3), keepdims=True)
    xn = (x - m) * jax.lax.rsqrt(m + EPS)                 # rsqrt of the MEAN, as in the spec
    return xn * (style[:, 0] + 1.0) + style[:, 1]


if __name__ == "__main__":
    # Small deterministic setup: batch=2, feat_size=4, 16x16 spatial, dlatent=8.
    N, C, H, W, D = 2, 4, 16, 16, 8

    key = jax.random.PRNGKey(0)
    kx, kd, kw, kb = jax.random.split(key, 4)

    # Positive activations so rsqrt(mean) stays finite (the reference module
    # takes rsqrt of the MEAN, which NaNs whenever a per-channel mean <= -eps).
    x = jax.random.uniform(kx, (N, C, H, W), jnp.float32, minval=0.1, maxval=2.0)
    dlatent = jax.random.normal(kd, (N, D), jnp.float32)

    bound = 1.0 / (D ** 0.5)
    weight = jax.random.uniform(kw, (2 * C, D), jnp.float32, minval=-bound, maxval=bound)
    bias = jax.random.uniform(kb, (2 * C,), jnp.float32, minval=-bound, maxval=bound)

    ref = reference_adain(x, dlatent, weight, bias)

    # Fused single-pass path (channel-only tiling).
    out = jax.block_until_ready(adain_forward(x, dlatent, weight, bias))
    assert out.shape == (N, C, H, W)
    assert jnp.allclose(out, ref, atol=1e-5, rtol=1e-5), "fused path mismatch vs reference"

    # Exercise the large-HW two-pass path (XLA mean + Pallas modulate) by
    # forcing a tiny block budget; must produce the same result.
    out2 = jax.block_until_ready(
        adain_forward(x, dlatent, weight, bias, target_bytes=1024))
    assert jnp.allclose(out2, ref, atol=1e-5, rtol=1e-5), "two-pass path mismatch vs reference"

    print("KERNEL_OK")
</pallas_src>

<mosaic_0001>
module attributes {stable_mosaic.version = 11 : i64} {
  func.func @_adain_fused_kernel(%arg0: i32, %arg1: i32, %arg2: memref<1x4x256xf32, #tpu.memory_space<vmem>>, %arg3: memref<1x4x2xf32, #tpu.memory_space<vmem>>, %arg4: memref<1x4x256xf32, #tpu.memory_space<vmem>>) attributes {dimension_semantics = [#tpu.dimension_semantics<parallel>, #tpu.dimension_semantics<parallel>], iteration_bounds = array<i64: 2, 1>, scalar_prefetch = 0 : i64, scratch_operands = 0 : i64, tpu.core_type = #tpu.core_type<tc>, window_params = [{transform_indices = @transform_0, window_bounds = array<i64: 1, 4, 256>}, {transform_indices = @transform_1, window_bounds = array<i64: 1, 4, 2>}, {transform_indices = @transform_2, window_bounds = array<i64: 1, 4, 256>}]} {
    %c0 = arith.constant 0 : index
    %c0_0 = arith.constant 0 : index
    %c0_1 = arith.constant 0 : index
    %0 = vector.load %arg2[%c0, %c0_0, %c0_1] : memref<1x4x256xf32, #tpu.memory_space<vmem>>, vector<1x4x256xf32>
    %cst = arith.constant dense<0.000000e+00> : vector<1x4xf32>
    %1 = vector.multi_reduction <add>, %0, %cst [2] : vector<1x4x256xf32> to vector<1x4xf32>
    %2 = vector.shape_cast %1 : vector<1x4xf32> to vector<1x4x1xf32>
    %cst_2 = arith.constant 2.560000e+02 : f32
    %3 = vector.broadcast %cst_2 : f32 to vector<1x4x1xf32>
    %4 = arith.divf %2, %3 : vector<1x4x1xf32>
    %c0_3 = arith.constant 0 : index
    %c0_4 = arith.constant 0 : index
    %c0_5 = arith.constant 0 : index
    %5 = vector.load %arg3[%c0_3, %c0_4, %c0_5] : memref<1x4x2xf32, #tpu.memory_space<vmem>>, vector<1x4x2xf32>
    %6 = vector.extract_strided_slice %5 {offsets = [0, 0, 0], sizes = [1, 4, 1], strides = [1, 1, 1]} : vector<1x4x2xf32> to vector<1x4x1xf32>
    %7 = vector.extract_strided_slice %5 {offsets = [0, 0, 1], sizes = [1, 4, 1], strides = [1, 1, 1]} : vector<1x4x2xf32> to vector<1x4x1xf32>
    %cst_6 = arith.constant 9.99999993E-9 : f32
    %8 = vector.broadcast %cst_6 : f32 to vector<1x4x1xf32>
    %9 = arith.addf %4, %8 : vector<1x4x1xf32>
    %10 = math.rsqrt %9 : vector<1x4x1xf32>
    %11 = arith.mulf %10, %6 : vector<1x4x1xf32>
    %12 = arith.mulf %4, %11 : vector<1x4x1xf32>
    %13 = arith.subf %7, %12 : vector<1x4x1xf32>
    %c0_7 = arith.constant 0 : index
    %c0_8 = arith.constant 0 : index
    %c0_9 = arith.constant 0 : index
    %14 = vector.load %arg2[%c0_7, %c0_8, %c0_9] : memref<1x4x256xf32, #tpu.memory_space<vmem>>, vector<1x4x256xf32>
    %15 = vector.broadcast %11 : vector<1x4x1xf32> to vector<1x4x256xf32>
    %16 = arith.mulf %14, %15 : vector<1x4x256xf32>
    %17 = vector.broadcast %13 : vector<1x4x1xf32> to vector<1x4x256xf32>
    %18 = arith.addf %16, %17 : vector<1x4x256xf32>
    %c0_10 = arith.constant 0 : index
    %c0_11 = arith.constant 0 : index
    %c0_12 = arith.constant 0 : index
    %19 = vector.load %arg4[%c0_10, %c0_11, %c0_12] : memref<1x4x256xf32, #tpu.memory_space<vmem>>, vector<1x4x256xf32>
    tpu.vector_store %arg4[%c0_10, %c0_11, %c0_12], %18 {strides = array<i32>} : memref<1x4x256xf32, #tpu.memory_space<vmem>>, vector<1x4x256xf32>,
    return
  }
  func.func @transform_0(%arg0: i32, %arg1: i32) -> (i32, i32, i32) {
    %c0_i32 = arith.constant 0 : i32
    %c0_i32_0 = arith.constant 0 : i32
    return %arg0, %arg1, %c0_i32 : i32, i32, i32
  }
  func.func @transform_1(%arg0: i32, %arg1: i32) -> (i32, i32, i32) {
    %c0_i32 = arith.constant 0 : i32
    %c0_i32_0 = arith.constant 0 : i32
    return %arg0, %arg1, %c0_i32 : i32, i32, i32
  }
  func.func @transform_2(%arg0: i32, %arg1: i32) -> (i32, i32, i32) {
    %c0_i32 = arith.constant 0 : i32
    %c0_i32_0 = arith.constant 0 : i32
    return %arg0, %arg1, %c0_i32 : i32, i32, i32
  }
}

</mosaic_0001>

<bundles_post_ra>
// kernel: tpu_custom_call.1
= control target key start
LH: loop header
LB: loop body
LE: loop exit
PB: predicated region body
PF: predicated region fallthrough
CT: control target
= control target key end

     0   :  { %7 = vsyncpa [#allocation3], 0  ;;  %s735_s0 = inlined_call_operand.hbm [shape: f32[2,4,256], index: 0, kind: input, shape index: {}]   ;;  %s736_s1 = inlined_call_operand.vmem [shape: f32[2,4,2], index: 1, kind: input, shape index: {}]   ;;  %s737_s2 = inlined_call_operand.hbm [shape: f32[2,4,256], index: 2, kind: output, shape index: {}]  }
   0x1   :  { %9 = vsyncpa [#allocation3 + $0x1], 0 }
   0x2   :  { %10 = vsyncpa [#allocation4], 0 }
   0x3   :  { %12 = vsyncpa [#allocation4 + $0x1], 0  ;;  %s592_s9 = smov 0   ;;  %s594_s10 = smov 0  }
   0x4   :  { %s596_s11 = smov 0   ;;  %s598_s12 = smov 0  }
   0x5   :  { %s600_s13 = smov 0   ;;  %s602_s14 = smov 0  }
   0x6 LB: > { %s371_s15 = sadd.s32 4294967295, %s569_s14   ;;  %s372_s16 = sadd.s32 4294967294, %s569_s14   ;;  %s569_s14 = sphi %s602_s14, %s18_s14   ;;  %s565_s13 = sphi %s600_s13, %s749_s13   ;;  %s561_s12 = sphi %s598_s12, %s748_s12   ;;  %s557_s11 = sphi %s596_s11, %s747_s11   ;;  %s553_s10 = sphi %s594_s10, %s746_s10   ;;  %s549_s9 = sphi %s592_s9, %s745_s9  }
   0x7   : > { %s30_s17 = sadd.s32 1, %s565_s13  ;;  %s39_s18 = sadd.s32 1, %s557_s11 }
   0x8   : > { %p32_p0 = scmp.ge.s32.totalorder %s30_s17, 2  ;;  %p46_p1 = scmp.ne.s32.totalorder %s557_s11, %s553_s10 }
   0x9   : > { %p47_p2 = scmp.eq.s32.totalorder %s569_s14, 0  ;;  %p52_p3 = scmp.ne.s32.totalorder %s553_s10, %s549_s9 }
   0xa   : > { %s751_s17 = smov (%p32_p0, %s30_s17), 0  ;;  %p53_p5 = scmp.eq.s32.totalorder %s371_s15, 0 }
   0xb   : > { %p633_p4 = por %p47_p2, %p46_p1  ;;  %s34_s20 = ssub.s32 %s565_s13, %s751_s17 }
   0xc   : > { %p106_p6 = scmp.eq.s32.totalorder %s371_s15, 1  ;;  %p37_p7 = scmp.eq.s32.totalorder %s34_s20, 0 }
   0xd   : > { %p639_p8 = por %p53_p5, %p52_p3  ;;  %p112_p10 = scmp.eq.s32.totalorder %s372_s16, 1 }
   0xe   : > { %p643_p9 = por %p106_p6, %p46_p1  ;;  %p401_p13 = scmp.lt.s32.totalorder %s569_s14, 2 }
   0xf   : > { %s648_s23 = scalar_select %p37_p7, %s557_s11, %s39_s18  }
  0x10   : > { %p650_p11 = por %p112_p10, %p52_p3  ;;  %s132_s25 = sand.u32 1, %s557_s11  }
  0x11   : > { %s375_s26 = sshll.u32 %s132_s25, 3  ;;  %s387_s27 = sshll.u32 %s565_s13, 7 }
  0x12   : > { %s741_s24 = scalar_select %p650_p11, 1, 0 }
  0x13   : > { %s144_s30 = scalar_lea.hbm %s735_s0, %s387_s27  ;;  %s136_s3 = scalar_lea.vmem [#allocation2], %s375_s26 }
  0x14   : > { %s146_s4 = sshll.u32 %s136_s3, 4  ;;  %p663_p0 = pnand %p401_p13, %p633_p4  ;;  %s147_s4 = int_to_ptr.vmem [resolvable:$true] %s146_s4 }
  0x15   : > { %p378_p1 = scmp.ge.s32.totalorder %s569_s14, 1  ;;  %p161_p2 = scmp.lt.s32.totalorder %s569_s14, 3 }
  0x16   : > { %s133_s6 = scalar_lea.sflag [#allocation3], %s132_s25  ;;  %p463_p3 = pneg %p663_p0 }
  0x17   : > { %s474_s7 = scalar_lea.vmem %s147_s4, 128  ;;  %s571_s8 = smov [#allocation2]  }
  0x18   : > { %p475_p5 = scmp.ne.s32.totalorder %s147_s4, %s474_s7  ;;  %s479_s15 = sshll.u32 %s571_s8, 4  ;;  %s480_s15 = int_to_ptr.vmem [resolvable:$false] %s479_s15 }
  0x19   : > { %s481_s16 = scalar_lea.vmem %s480_s15, 256  ;;  %p482_p10 = scmp.lt.s32.totalorder %s147_s4, %s480_s15 }
  0x1a   : > { %p477_p6 = pnand %p475_p5, %p463_p3  ;;  %p483_p12 = scmp.lt.s32.totalorder %s481_s16, %s474_s7 }
  0x1c   : > { %p478_p7 = pneg %p477_p6  ;;  %p484_p4 = por %p483_p12, %p482_p10 }
  0x1e   : > { %p485_p13 = pnand %p484_p4, %p478_p7 }
  0x20   : > { %488 = shalt.err (!%p485_p13)
}
  0x21   : > { %396 = dma.hbm_to_vmem [thread:$0]  (!%p663_p0), %s144_s30, 128, %s147_s4, %s133_s6  }
  0x22   : > { %p162_p11 = pnand %p378_p1, %p161_p2 }
  0x23   : > { %s678_s18 = sand.u32 (!%p162_p11), 1, %s553_s10  }
  0x24   : > { %165 = sbr.rel (%p162_p11) target bundleno = 466 (0x1d2), region = 28  ;;  %s379_s19 = sshll.u32 (!%p162_p11), %s678_s18, 3 }
  0x25   : > { %s168_s20 = scalar_lea.sflag (!%p162_p11), [#allocation3], %s678_s18  ;;  %s171_s25 = scalar_lea.vmem (!%p162_p11), [#allocation2], %s379_s19 }
  0x29   : > { %540 = dma.done.wait (%p639_p8), %s168_s20, 128  }
  0x2a   : > { %542 = vsyncadd (%p639_p8), %s168_s20, 4294967168  ;;  %vm210_vm0 = vcmask 1043456   ;;  %v206_v0 = vld [vmem:[%s171_s25] sm:$0xff]  ;;  %v572_v5 = vmov 0   ;;  %p199_p11 = scmp.lt.s32.totalorder %s561_s12, 1  ;;  %v573_v9 = vmov 1   ;;  %v235_v18 = vlaneseq }
  0x2b   : > { %v208_v1 = vcombine.high %v206_v0, %v206_v0  ;;  %v211_v2 = vsel %vm210_vm0, %v206_v0, 0.0  ;;  %455 = vset.pattern.permute.xlu1 %v572_v5  ;;  %457 = vset.pattern.permute.xlu0 %v573_v9  ;;  %s574_s30 = smov 1   ;;  %v575_v16 = vmov 839922192   ;;  %s388_s3 = sshll.u32 %s561_s12, 7 }
  0x2c   : > { %s200_s26 = scalar_select %p199_p11, %s561_s12, 1  ;;  %v233_v17 = vunpack.c.l.s4 %v575_v16  ;;  %v236_v20 = vshrl.u32 %v235_v18, 7 }
  0x2d   : > { %v212_v3 = vsel %vm210_vm0, %v208_v1, 0.0  ;;  %s198_s4 = scalar_lea.vmem [#allocation5], %s379_s19  ;;  %s270_s8 = scalar_lea.hbm %s737_s2, %s388_s3 }
  0x2e   : > { %v213_v4 = vadd.f32 %v212_v3, %v211_v2  ;;  %s381_s27 = sshll.u32 %s200_s26, 2  ;;  %v234_v19 = vunpack.c.0.s8 %v233_v17  ;;  %s272_s5 = sshll.u32 %s198_s4, 4  ;;  %s273_s5 = int_to_ptr.vmem [resolvable:$true] %s272_s5 }
  0x2f   : > { %s205_s29 = scalar_lea.vmem %s736_s1, %s381_s27  ;;  %s256_s15 = scalar_lea.sflag [#allocation4], %s678_s18 }
  0x30   : > { %214 = vadd.xlane.f32.xlu0 %v213_v4  ;;  %v218_v10 = vld [vmem:[%s205_s29] sm:$0xf]  ;;  %v237_v21 = vsub.s32 %v234_v19, %v236_v20  ;;  %s489_s16 = scalar_lea.vmem %s273_s5, 128  ;;  %s576_s20 = smov [#allocation5]  }
  0x31   : > { %p490_p8 = scmp.ne.s32.totalorder %s273_s5, %s489_s16  ;;  %s493_s12 = sshll.u32 %s576_s20, 4  ;;  %s494_s12 = int_to_ptr.vmem [resolvable:$false] %s493_s12 }
  0x32   : > { %s495_s19 = scalar_lea.vmem %s494_s12, 256  ;;  %p496_p1 = scmp.lt.s32.totalorder %s273_s5, %s494_s12 }
  0x33   : > { %p491_p12 = pnand %p490_p8, %p643_p9  ;;  %p497_p2 = scmp.lt.s32.totalorder %s495_s19, %s489_s16 }
  0x35   : > { %p492_p0 = pneg %p491_p12  ;;  %p498_p3 = por %p497_p2, %p496_p1 }
  0x37   : > { %p499_p5 = pnand %p498_p3, %p492_p0 }
  0xb9   : > { %v215_v6 = vpop.xlane.xlu0 %214 }
  0xba   : > { %v217_v7 = vmul.f32 0.00390625, %v215_v6 }
  0xbc   : > { %v219_v8 = vadd.f32 1e-08, %v217_v7 }
  0xbe   : > { %459 = vrsqrt.f32 %v219_v8 }
  0xcb   : > { %v460_v11 = vpop.eup %459 }
  0xcc   : > { %v221_v12 = vmul.f32 %v460_v11, %v218_v10 }
  0xce   : > { %230 = vperm.xlu1 %455, %v221_v12   ;;  %v222_v13 = vmul.f32 %v221_v12, %v217_v7 }
  0xd0   : > { %224 = vrot.lane.b32.xlu0 %v222_v13, %s574_s30 }
  0xd2   : > { %456 = vset.pattern.permute.xlu1 %v573_v9 }
 0x142   : > { %v225_v14 = vpop.permute.xlu0 %224 }
 0x143   : > { %v227_v15 = vsub.f32 %v218_v10, %v225_v14 }
 0x145   : > { %243 = vperm.xlu1 %456, %v227_v15  }
 0x149   : > { %v231_v22 = vpop.permute.xlu1 %230 }
 0x14a   : > { %v238_v23 = vrot.slane %v231_v22, %v237_v21 }
 0x14c   : > { %v240_v25 = vmul.f32 %v238_v23, %v206_v0 }
 0x1c0   : > { %v244_v24 = vpop.permute.xlu1 %243 }
 0x1c1   : > { %v251_v26 = vrot.slane %v244_v24, %v237_v21 }
 0x1c3   : > { %v253_v27 = vadd.f32 %v251_v26, %v240_v25 }
 0x1c5   : > { %254 = vst [vmem:[%s198_s4] sm:$0xff] %v253_v27 }
 0x1c6   : > { %502 = shalt.err (!%p499_p5)
}
 0x1c7   : > { %s503_s25 = scalar_lea.hbm %s270_s8, 128  ;;  %s507_s27 = scalar_lea.hbm %s737_s2, 256 }
 0x1c8   : > { %p504_p6 = scmp.ne.s32.totalorder %s270_s8, %s503_s25  ;;  %p508_p4 = scmp.lt.s32.totalorder %s270_s8, %s737_s2 }
 0x1c9   : > { %p509_p13 = scmp.lt.s32.totalorder %s507_s27, %s503_s25 }
 0x1ca   : > { %p505_p7 = pnand %p504_p6, %p643_p9 }
 0x1cb   : > { %p510_p11 = por %p509_p13, %p508_p4 }
 0x1cc   : > { %p506_p10 = pneg %p505_p7 }
 0x1ce   : > { %p511_p8 = pnand %p510_p11, %p506_p10 }
 0x1d0   : > { %514 = shalt.err (!%p511_p8)
}
 0x1d1   : > { %391 = dma.vmem_to_hbm [thread:$0]  (%p643_p9), %s273_s5, 128, %s270_s8, %s256_s15  }
 0x1d2 PF: > { %s284_s29 = sand.u32 1, %s549_s9   ;;  %p743_p12 = scmp.ne.s32.totalorder %s741_s24, 0 }
 0x1d3   : > { %p744_p0 = scmp.ge.s32.totalorder %s569_s14, 2  ;;  %s285_s30 = scalar_lea.sflag [#allocation4], %s284_s29 }
 0x1d5   : > { %p398_p1 = pnand %p744_p0, %p743_p12 }
 0x1d7   : > { %p399_p2 = pneg %p398_p1 }
 0x1d9   : > { %544 = dma.done.wait (%p399_p2), %s285_s30, 128  }
 0x1da   : > { %546 = vsyncadd (%p399_p2), %s285_s30, 4294967168  ;;  %s18_s14 = sadd.s32 1, %s569_s14   ;;  %s745_s9 = smov %s553_s10 }
 0x1db   : > { %p15_p3 = scmp.ge.s32.totalorder %s18_s14, 4   ;;  %s746_s10 = smov %s557_s11 }
 0x1dc   : > { %s747_s11 = smov %s648_s23  ;;  %s748_s12 = smov %s565_s13 }
 0x1dd   : > { %s749_s13 = smov %s751_s17  ;;  %17 = sbr.rel (!%p15_p3) target bundleno = 6 (0x6), region = 76 }
 0x1e2   :  { %290 = vsyncpa [#allocation3], 1 }
 0x1e3   :  { %292 = vsyncpa [#allocation3 + $0x1], 1 }
 0x1e4   :  { %293 = vsyncpa [#allocation4], 1 }
 0x1e5   :  { %295 = vsyncpa [#allocation4 + $0x1], 1 }

</bundles_post_ra>
